<compile_context>
chip_gen: v5e
topology: v5e:2x2
jax: 0.10.0
libtpu: 0.0.40
codegen_flags: <defaults>
</compile_context>

<pallas_src>
import functools

import jax
import jax.numpy as jnp
import numpy as np
from jax import lax
from jax.experimental import pallas as pl
from jax.experimental.pallas import tpu as pltpu

EPS = 1e-5
_FUSED_KERNEL_OK = True  # flips to False if the fused kernel fails to lower on this toolchain


# ---------------------------------------------------------------------------
# helpers
# ---------------------------------------------------------------------------
def _round_up(x, m):
    return ((x + m - 1) // m) * m


def _pick_spatial_tile(hw, w_img, max_tile=2048):
    """Lane-dense spatial tile: multiple of 128, >= conv halo (2W+2), prefers divisors of HW."""
    min_tl = max(128, _round_up(2 * w_img + 2, 128))
    cap = max(max_tile, min_tl)
    for tl in (2048, 1024, 512, 256, 128):
        if min_tl <= tl <= cap and hw % tl == 0:
            return tl
    ntiles = max(1, -(-hw // cap))
    return max(min_tl, _round_up(-(-hw // ntiles), 128))


def _fold_params(params):
    """Fold conv bias + eval-mode BatchNorm into one (Cout, 9*(Cin+1)) bf16 weight matrix.

    Column layout k = (kh*3 + kw)*(Cin+1) + c.  Channel c == Cin is a constant ones-channel
    carried with the input; the folded bias sits in the centre-tap slot of that channel.
    """
    w, b_conv, gamma, beta, r_mean, r_var = params
    cout, cin, _, _ = w.shape
    scale = gamma / jnp.sqrt(r_var + EPS)
    bias = beta + (b_conv - r_mean) * scale
    w_perm = jnp.transpose(w * scale[:, None, None, None], (0, 2, 3, 1))   # (O, kh, kw, I)
    w_perm = jnp.pad(w_perm, ((0, 0), (0, 0), (0, 0), (0, 1)))             # (O, kh, kw, I+1)
    w_perm = w_perm.at[:, 1, 1, cin].set(bias)                             # bias * ones-channel
    return w_perm.reshape(cout, 9 * (cin + 1)).astype(jnp.bfloat16)


def _pack_input(x_nchw, hw, flatp, w_img):
    """(N, Cin, H, W) f32 -> (N, Cin+1, FLATP) bf16: flattened HW plus a ones channel, with
    (W+1) leading zeros and trailing zeros to FLATP (they provide the kh = +/-1 halo rows)."""
    n, cin, _, _ = x_nchw.shape
    x_flat = x_nchw.astype(jnp.bfloat16).reshape(n, cin, hw)
    ones = jnp.ones((n, 1, hw), jnp.bfloat16)
    x4 = jnp.concatenate([x_flat, ones], axis=1)
    lead = w_img + 1
    return jnp.pad(x4, ((0, 0), (0, 0), (lead, flatp - lead - hw)))


def _edge_masks(hwpad, w_img):
    """(2, HWpad) bf16 multiplicative masks: row 0 zeroes kw=-1 taps at image column 0,
    row 1 zeroes kw=+1 taps at image column W-1."""
    col = np.arange(hwpad) % w_img
    left = (col != 0).astype(np.float32)
    right = (col != w_img - 1).astype(np.float32)
    return jnp.asarray(np.stack([left, right]), dtype=jnp.bfloat16)


# ---------------------------------------------------------------------------
# fused kernel: in-VMEM im2col + single MXU matmul + ReLU
# ---------------------------------------------------------------------------
def _fused_conv_kernel(cur_ref, nxt_ref, mask_ref, w_ref, o_ref, slab_ref, patch_ref,
                       *, w_img, tl, pad2, cp):
    # cur_ref/nxt_ref: (Cp, TL) bf16   current / next tile of the padded flat input
    # mask_ref:        (2, TL)  bf16   left/right column-edge masks for this tile
    # w_ref:           (Cout, 9*Cp) bf16  BN-and-bias-folded weights
    # o_ref:           (Cout, TL) output tile, NCHW (flattened HW) order
    # slab_ref:        (Cp, TL + pad) bf16 VMEM scratch (tile + right halo)
    # patch_ref:       (9*Cp, TL) bf16 VMEM scratch (im2col patch, built in-kernel)
    slab_ref[:, :tl] = cur_ref[...]
    slab_ref[:, tl:tl + pad2] = nxt_ref[:, :pad2]
    mk = mask_ref[...]
    left = mk[0:1, :]
    right = mk[1:2, :]
    for kh in range(3):
        for kw in range(3):
            tap_idx = kh * 3 + kw
            off = kh * w_img + kw                    # static shift into the halo'd slab
            tap = slab_ref[:, off:off + tl]          # (Cp, TL)
            if kw == 0:
                tap = tap * left                     # zero x(r, -1) contributions
            elif kw == 2:
                tap = tap * right                    # zero x(r, W) contributions
            patch_ref[cp * tap_idx:cp * (tap_idx + 1), :] = tap
    acc = jnp.dot(w_ref[...], patch_ref[...], preferred_element_type=jnp.float32)
    o_ref[...] = jnp.maximum(acc, 0.0).astype(o_ref.dtype)


def _forward_fused(x4p, masks, w_mat, *, n, cout, hwpad, tl, pad2, w_img, cp, out_dtype, flops):
    num_tiles = hwpad // tl
    kp = w_mat.shape[1]
    kernel = functools.partial(_fused_conv_kernel, w_img=w_img, tl=tl, pad2=pad2, cp=cp)
    bytes_accessed = int(2 * x4p.size * 2 + masks.size * 2 + w_mat.size * 2
                         + n * cout * hwpad * np.dtype(out_dtype).itemsize)
    return pl.pallas_call(
        kernel,
        out_shape=jax.ShapeDtypeStruct((n, cout, hwpad), out_dtype),
        grid_spec=pltpu.PrefetchScalarGridSpec(
            num_scalar_prefetch=0,
            grid=(n, num_tiles),
            in_specs=[
                pl.BlockSpec((None, cp, tl), lambda b, t: (b, 0, t)),       # current tile
                pl.BlockSpec((None, cp, tl), lambda b, t: (b, 0, t + 1)),   # next tile (halo)
                pl.BlockSpec((2, tl), lambda b, t: (0, t)),                 # edge masks
                pl.BlockSpec((cout, kp), lambda b, t: (0, 0)),              # folded weights
            ],
            out_specs=pl.BlockSpec((None, cout, tl), lambda b, t: (b, 0, t)),
            scratch_shapes=[
                pltpu.VMEM((cp, tl + _round_up(pad2, 128)), jnp.bfloat16),  # slab
                pltpu.VMEM((kp, tl), jnp.bfloat16),                          # patch
            ],
        ),
        compiler_params=pltpu.CompilerParams(
            dimension_semantics=("parallel", "parallel"),
            vmem_limit_bytes=32 * 1024 * 1024,
        ),
        cost_estimate=pl.CostEstimate(flops=flops, transcendentals=0,
                                      bytes_accessed=bytes_accessed),
    )(x4p, x4p, masks, w_mat)


# ---------------------------------------------------------------------------
# fallback: wrapper-side im2col (same math), single-matmul kernel per tile
# ---------------------------------------------------------------------------
def _premade_patch_kernel(p_ref, w_ref, o_ref):
    acc = jnp.dot(w_ref[...], p_ref[...], preferred_element_type=jnp.float32)
    o_ref[...] = jnp.maximum(acc, 0.0).astype(o_ref.dtype)


def _forward_im2col(x4p, masks, w_mat, *, n, cout, hwpad, tl, w_img, cp, out_dtype, flops):
    kp = w_mat.shape[1]
    num_tiles = hwpad // tl
    taps = []
    for kh in range(3):
        for kw in range(3):
            off = kh * w_img + kw
            tap = lax.slice_in_dim(x4p, off, off + hwpad, axis=2)    # (N, Cp, HWpad)
            if kw == 0:
                tap = tap * masks[0][None, None, :]
            elif kw == 2:
                tap = tap * masks[1][None, None, :]
            taps.append(tap)
    patch = jnp.concatenate(taps, axis=1)                            # (N, 9*Cp, HWpad) bf16
    bytes_accessed = int(patch.size * 2 + w_mat.size * 2
                         + n * cout * hwpad * np.dtype(out_dtype).itemsize)
    return pl.pallas_call(
        _premade_patch_kernel,
        out_shape=jax.ShapeDtypeStruct((n, cout, hwpad), out_dtype),
        grid_spec=pltpu.PrefetchScalarGridSpec(
            num_scalar_prefetch=0,
            grid=(n, num_tiles),
            in_specs=[
                pl.BlockSpec((None, kp, tl), lambda b, t: (b, 0, t)),
                pl.BlockSpec((cout, kp), lambda b, t: (0, 0)),
            ],
            out_specs=pl.BlockSpec((None, cout, tl), lambda b, t: (b, 0, t)),
        ),
        compiler_params=pltpu.CompilerParams(
            dimension_semantics=("parallel", "parallel"),
            vmem_limit_bytes=32 * 1024 * 1024,
        ),
        cost_estimate=pl.CostEstimate(flops=flops, transcendentals=0,
                                      bytes_accessed=bytes_accessed),
    )(patch, w_mat)


# ---------------------------------------------------------------------------
# public forward
# ---------------------------------------------------------------------------
def client_vgg19x1_forward(x_nchw, params, *, out_dtype=jnp.bfloat16, max_tile=2048):
    """Conv2d(3->64, k3, s1, p1) + BatchNorm2d(64) (eval mode) + ReLU.

    x_nchw: (N, 3, H, W) float32 -> (N, 64, H, W) in out_dtype (bf16 by default: the kernel
    is HBM-bandwidth bound and the 64-channel writeback dominates traffic).
    """
    global _FUSED_KERNEL_OK
    n, cin, h, w_img = x_nchw.shape
    cout = params[0].shape[0]
    hw = h * w_img
    cp = cin + 1

    tl = _pick_spatial_tile(hw, w_img, max_tile)
    # Guarantee >= 2 parallel grid steps (v7x has 2 TensorCores sharded over parallel axes).
    if n * (-(-hw // tl)) < 2 and tl > 128:
        tl = _pick_spatial_tile(hw, w_img, max(128, tl // 2))
    num_tiles = -(-hw // tl)
    hwpad = num_tiles * tl
    pad2 = 2 * w_img + 2
    flatp = hwpad + tl            # one extra tile so the t+1 halo block always exists

    w_mat = _fold_params(params)                     # (64, 36) bf16, BN + bias folded
    x4p = _pack_input(x_nchw, hw, flatp, w_img)      # (N, 4, FLATP) bf16
    masks = _edge_masks(hwpad, w_img)                # (2, HWpad) bf16
    flops = 2 * n * hw * cout * 9 * cin
    common = dict(n=n, cout=cout, hwpad=hwpad, tl=tl, w_img=w_img, cp=cp,
                  out_dtype=out_dtype, flops=flops)

    out_flat = None
    if _FUSED_KERNEL_OK:
        try:
            out_flat = _forward_fused(x4p, masks, w_mat, pad2=pad2, **common)
            out_flat = jax.block_until_ready(out_flat)
        except Exception:  # lowering fallback for toolchains lacking shifted VMEM reads
            _FUSED_KERNEL_OK = False
            out_flat = None
    if out_flat is None:
        out_flat = _forward_im2col(x4p, masks, w_mat, **common)

    if hwpad != hw:
        out_flat = out_flat[:, :, :hw]
    return out_flat.reshape(n, cout, h, w_img)


# ---------------------------------------------------------------------------
# pure-JAX f32 reference + params
# ---------------------------------------------------------------------------
def reference_forward(x_nchw, params):
    w, b_conv, gamma, beta, r_mean, r_var = params
    y = lax.conv_general_dilated(
        x_nchw, w, window_strides=(1, 1), padding=((1, 1), (1, 1)),
        dimension_numbers=('NCHW', 'OIHW', 'NCHW'))
    y = y + b_conv[None, :, None, None]
    y = gamma[None, :, None, None] * (y - r_mean[None, :, None, None]) \
        / jnp.sqrt(r_var[None, :, None, None] + EPS) + beta[None, :, None, None]
    return jnp.maximum(y, 0.0)


def init_params(key):
    cout, cin, k = 64, 3, 3
    k1, k2, k3, k4, k5, k6 = jax.random.split(key, 6)
    fan_in = cin * k * k
    w = jax.random.uniform(k1, (cout, cin, k, k), jnp.float32,
                           -1.0 / np.sqrt(fan_in), 1.0 / np.sqrt(fan_in))
    b_conv = jax.random.uniform(k2, (cout,), jnp.float32,
                                -1.0 / np.sqrt(fan_in), 1.0 / np.sqrt(fan_in))
    gamma = 1.0 + 0.1 * jax.random.normal(k3, (cout,), jnp.float32)
    beta = 0.1 * jax.random.normal(k4, (cout,), jnp.float32)
    r_mean = 0.1 * jax.random.normal(k5, (cout,), jnp.float32)
    r_var = jax.nn.softplus(jax.random.normal(k6, (cout,), jnp.float32)) + 0.5
    return (w, b_conv, gamma, beta, r_mean, r_var)


if __name__ == "__main__":
    key = jax.random.PRNGKey(0)
    kx, kp = jax.random.split(key)

    N, C, H, W = 2, 3, 16, 16
    x = jax.random.normal(kx, (N, C, H, W), jnp.float32)
    params = init_params(kp)

    ref = jax.block_until_ready(reference_forward(x, params))

    out = client_vgg19x1_forward(x, params)
    out = jax.block_until_ready(out)
    assert out.shape == (N, 64, H, W), out.shape
    # bf16 operands + bf16 output => loosened tolerance vs the f32 reference.
    np.testing.assert_allclose(np.asarray(out.astype(jnp.float32)), np.asarray(ref),
                               rtol=5e-2, atol=5e-2)

    # Also exercise the multi-tile path (tile boundary inside the image, halo across tiles).
    out2 = client_vgg19x1_forward(x, params, max_tile=128)
    out2 = jax.block_until_ready(out2)
    np.testing.assert_allclose(np.asarray(out2.astype(jnp.float32)), np.asarray(ref),
                               rtol=5e-2, atol=5e-2)

    print("KERNEL_OK")
</pallas_src>

<mosaic_0001>
module attributes {stable_mosaic.version = 11 : i64} {
  func.func @_fused_conv_kernel(%arg0: i32, %arg1: i32, %arg2: memref<1x4x256xbf16, #tpu.memory_space<vmem>>, %arg3: memref<1x4x256xbf16, #tpu.memory_space<vmem>>, %arg4: memref<2x256xbf16, #tpu.memory_space<vmem>>, %arg5: memref<64x36xbf16, #tpu.memory_space<vmem>>, %arg6: memref<1x64x256xbf16, #tpu.memory_space<vmem>>, %arg7: memref<4x384xbf16, #tpu.memory_space<vmem>>, %arg8: memref<36x256xbf16, #tpu.memory_space<vmem>>) attributes {dimension_semantics = [#tpu.dimension_semantics<parallel>, #tpu.dimension_semantics<parallel>], iteration_bounds = array<i64: 2, 1>, scalar_prefetch = 0 : i64, scratch_operands = 2 : i64, tpu.core_type = #tpu.core_type<tc>, window_params = [{transform_indices = @transform_0, window_bounds = array<i64: 1, 4, 256>}, {transform_indices = @transform_1, window_bounds = array<i64: 1, 4, 256>}, {transform_indices = @transform_2, window_bounds = array<i64: 2, 256>}, {pipeline_mode = #tpu.pipeline_mode<synchronous>, transform_indices = @transform_3, window_bounds = array<i64: 64, 36>}, {transform_indices = @transform_4, window_bounds = array<i64: 1, 64, 256>}]} {
    %c0 = arith.constant 0 : index
    %c0_0 = arith.constant 0 : index
    %c0_1 = arith.constant 0 : index
    %0 = vector.load %arg2[%c0, %c0_0, %c0_1] : memref<1x4x256xbf16, #tpu.memory_space<vmem>>, vector<1x4x256xbf16>
    %1 = vector.shape_cast %0 : vector<1x4x256xbf16> to vector<4x256xbf16>
    %c0_2 = arith.constant 0 : index
    %c0_3 = arith.constant 0 : index
    %2 = vector.load %arg7[%c0_2, %c0_3] : memref<4x384xbf16, #tpu.memory_space<vmem>>, vector<4x256xbf16>
    tpu.vector_store %arg7[%c0_2, %c0_3], %1 {strides = array<i32>} : memref<4x384xbf16, #tpu.memory_space<vmem>>, vector<4x256xbf16>,
    %c0_4 = arith.constant 0 : index
    %c0_5 = arith.constant 0 : index
    %c0_6 = arith.constant 0 : index
    %3 = vector.load %arg3[%c0_4, %c0_5, %c0_6] : memref<1x4x256xbf16, #tpu.memory_space<vmem>>, vector<1x4x34xbf16>
    %4 = vector.shape_cast %3 : vector<1x4x34xbf16> to vector<4x34xbf16>
    %c0_7 = arith.constant 0 : index
    %c256 = arith.constant 256 : index
    %5 = vector.load %arg7[%c0_7, %c256] : memref<4x384xbf16, #tpu.memory_space<vmem>>, vector<4x34xbf16>
    tpu.vector_store %arg7[%c0_7, %c256], %4 {strides = array<i32>} : memref<4x384xbf16, #tpu.memory_space<vmem>>, vector<4x34xbf16>,
    %c0_8 = arith.constant 0 : index
    %c0_9 = arith.constant 0 : index
    %6 = vector.load %arg4[%c0_8, %c0_9] : memref<2x256xbf16, #tpu.memory_space<vmem>>, vector<2x256xbf16>
    %7 = vector.extract_strided_slice %6 {offsets = [0, 0], sizes = [1, 256], strides = [1, 1]} : vector<2x256xbf16> to vector<1x256xbf16>
    %8 = vector.extract_strided_slice %6 {offsets = [1, 0], sizes = [1, 256], strides = [1, 1]} : vector<2x256xbf16> to vector<1x256xbf16>
    %c0_10 = arith.constant 0 : index
    %c0_11 = arith.constant 0 : index
    %9 = vector.load %arg7[%c0_10, %c0_11] : memref<4x384xbf16, #tpu.memory_space<vmem>>, vector<4x256xbf16>
    %10 = vector.broadcast %7 : vector<1x256xbf16> to vector<4x256xbf16>
    %11 = arith.mulf %9, %10 : vector<4x256xbf16>
    %c0_12 = arith.constant 0 : index
    %c0_13 = arith.constant 0 : index
    %12 = vector.load %arg8[%c0_12, %c0_13] : memref<36x256xbf16, #tpu.memory_space<vmem>>, vector<4x256xbf16>
    tpu.vector_store %arg8[%c0_12, %c0_13], %11 {strides = array<i32>} : memref<36x256xbf16, #tpu.memory_space<vmem>>, vector<4x256xbf16>,
    %c0_14 = arith.constant 0 : index
    %c1 = arith.constant 1 : index
    %13 = vector.load %arg7[%c0_14, %c1] : memref<4x384xbf16, #tpu.memory_space<vmem>>, vector<4x256xbf16>
    %c4 = arith.constant 4 : index
    %c0_15 = arith.constant 0 : index
    %14 = vector.load %arg8[%c4, %c0_15] : memref<36x256xbf16, #tpu.memory_space<vmem>>, vector<4x256xbf16>
    tpu.vector_store %arg8[%c4, %c0_15], %13 {strides = array<i32>} : memref<36x256xbf16, #tpu.memory_space<vmem>>, vector<4x256xbf16>,
    %c0_16 = arith.constant 0 : index
    %c2 = arith.constant 2 : index
    %15 = vector.load %arg7[%c0_16, %c2] : memref<4x384xbf16, #tpu.memory_space<vmem>>, vector<4x256xbf16>
    %16 = vector.broadcast %8 : vector<1x256xbf16> to vector<4x256xbf16>
    %17 = arith.mulf %15, %16 : vector<4x256xbf16>
    %c8 = arith.constant 8 : index
    %c0_17 = arith.constant 0 : index
    %18 = vector.load %arg8[%c8, %c0_17] : memref<36x256xbf16, #tpu.memory_space<vmem>>, vector<4x256xbf16>
    tpu.vector_store %arg8[%c8, %c0_17], %17 {strides = array<i32>} : memref<36x256xbf16, #tpu.memory_space<vmem>>, vector<4x256xbf16>,
    %c0_18 = arith.constant 0 : index
    %c16 = arith.constant 16 : index
    %19 = vector.load %arg7[%c0_18, %c16] : memref<4x384xbf16, #tpu.memory_space<vmem>>, vector<4x256xbf16>
    %20 = vector.broadcast %7 : vector<1x256xbf16> to vector<4x256xbf16>
    %21 = arith.mulf %19, %20 : vector<4x256xbf16>
    %c12 = arith.constant 12 : index
    %c0_19 = arith.constant 0 : index
    %22 = vector.load %arg8[%c12, %c0_19] : memref<36x256xbf16, #tpu.memory_space<vmem>>, vector<4x256xbf16>
    tpu.vector_store %arg8[%c12, %c0_19], %21 {strides = array<i32>} : memref<36x256xbf16, #tpu.memory_space<vmem>>, vector<4x256xbf16>,
    %c0_20 = arith.constant 0 : index
    %c17 = arith.constant 17 : index
    %23 = vector.load %arg7[%c0_20, %c17] : memref<4x384xbf16, #tpu.memory_space<vmem>>, vector<4x256xbf16>
    %c16_21 = arith.constant 16 : index
    %c0_22 = arith.constant 0 : index
    %24 = vector.load %arg8[%c16_21, %c0_22] : memref<36x256xbf16, #tpu.memory_space<vmem>>, vector<4x256xbf16>
    tpu.vector_store %arg8[%c16_21, %c0_22], %23 {strides = array<i32>} : memref<36x256xbf16, #tpu.memory_space<vmem>>, vector<4x256xbf16>,
    %c0_23 = arith.constant 0 : index
    %c18 = arith.constant 18 : index
    %25 = vector.load %arg7[%c0_23, %c18] : memref<4x384xbf16, #tpu.memory_space<vmem>>, vector<4x256xbf16>
    %26 = vector.broadcast %8 : vector<1x256xbf16> to vector<4x256xbf16>
    %27 = arith.mulf %25, %26 : vector<4x256xbf16>
    %c20 = arith.constant 20 : index
    %c0_24 = arith.constant 0 : index
    %28 = vector.load %arg8[%c20, %c0_24] : memref<36x256xbf16, #tpu.memory_space<vmem>>, vector<4x256xbf16>
    tpu.vector_store %arg8[%c20, %c0_24], %27 {strides = array<i32>} : memref<36x256xbf16, #tpu.memory_space<vmem>>, vector<4x256xbf16>,
    %c0_25 = arith.constant 0 : index
    %c32 = arith.constant 32 : index
    %29 = vector.load %arg7[%c0_25, %c32] : memref<4x384xbf16, #tpu.memory_space<vmem>>, vector<4x256xbf16>
    %30 = vector.broadcast %7 : vector<1x256xbf16> to vector<4x256xbf16>
    %31 = arith.mulf %29, %30 : vector<4x256xbf16>
    %c24 = arith.constant 24 : index
    %c0_26 = arith.constant 0 : index
    %32 = vector.load %arg8[%c24, %c0_26] : memref<36x256xbf16, #tpu.memory_space<vmem>>, vector<4x256xbf16>
    tpu.vector_store %arg8[%c24, %c0_26], %31 {strides = array<i32>} : memref<36x256xbf16, #tpu.memory_space<vmem>>, vector<4x256xbf16>,
    %c0_27 = arith.constant 0 : index
    %c33 = arith.constant 33 : index
    %33 = vector.load %arg7[%c0_27, %c33] : memref<4x384xbf16, #tpu.memory_space<vmem>>, vector<4x256xbf16>
    %c28 = arith.constant 28 : index
    %c0_28 = arith.constant 0 : index
    %34 = vector.load %arg8[%c28, %c0_28] : memref<36x256xbf16, #tpu.memory_space<vmem>>, vector<4x256xbf16>
    tpu.vector_store %arg8[%c28, %c0_28], %33 {strides = array<i32>} : memref<36x256xbf16, #tpu.memory_space<vmem>>, vector<4x256xbf16>,
    %c0_29 = arith.constant 0 : index
    %c34 = arith.constant 34 : index
    %35 = vector.load %arg7[%c0_29, %c34] : memref<4x384xbf16, #tpu.memory_space<vmem>>, vector<4x256xbf16>
    %36 = vector.broadcast %8 : vector<1x256xbf16> to vector<4x256xbf16>
    %37 = arith.mulf %35, %36 : vector<4x256xbf16>
    %c32_30 = arith.constant 32 : index
    %c0_31 = arith.constant 0 : index
    %38 = vector.load %arg8[%c32_30, %c0_31] : memref<36x256xbf16, #tpu.memory_space<vmem>>, vector<4x256xbf16>
    tpu.vector_store %arg8[%c32_30, %c0_31], %37 {strides = array<i32>} : memref<36x256xbf16, #tpu.memory_space<vmem>>, vector<4x256xbf16>,
    %c0_32 = arith.constant 0 : index
    %c0_33 = arith.constant 0 : index
    %39 = vector.load %arg5[%c0_32, %c0_33] : memref<64x36xbf16, #tpu.memory_space<vmem>>, vector<64x36xbf16>
    %c0_34 = arith.constant 0 : index
    %c0_35 = arith.constant 0 : index
    %40 = vector.load %arg8[%c0_34, %c0_35] : memref<36x256xbf16, #tpu.memory_space<vmem>>, vector<36x256xbf16>
    %cst = arith.constant dense<0.000000e+00> : vector<64x256xf32>
    %41 = tpu.matmul %39, %40, %cst {dimension_numbers = #tpu.dot_dimension_numbers<[1], [0], [0], [1], [0, 0, 1, 1], [], []>} : vector<64x36xbf16>, vector<36x256xbf16>, vector<64x256xf32> -> vector<64x256xf32>
    %cst_36 = arith.constant 0.000000e+00 : f32
    %42 = vector.broadcast %cst_36 : f32 to vector<64x256xf32>
    %43 = arith.maximumf %41, %42 : vector<64x256xf32>
    %44 = arith.truncf %43 : vector<64x256xf32> to vector<64x256xbf16>
    %c0_37 = arith.constant 0 : index
    %c0_38 = arith.constant 0 : index
    %c0_39 = arith.constant 0 : index
    %45 = vector.load %arg6[%c0_37, %c0_38, %c0_39] : memref<1x64x256xbf16, #tpu.memory_space<vmem>>, vector<1x64x256xbf16>
    %46 = vector.shape_cast %45 : vector<1x64x256xbf16> to vector<64x256xbf16>
    %47 = vector.shape_cast %44 : vector<64x256xbf16> to vector<1x64x256xbf16>
    tpu.vector_store %arg6[%c0_37, %c0_38, %c0_39], %47 {strides = array<i32>} : memref<1x64x256xbf16, #tpu.memory_space<vmem>>, vector<1x64x256xbf16>,
    return
  }
  func.func @transform_0(%arg0: i32, %arg1: i32) -> (i32, i32, i32) {
    %c0_i32 = arith.constant 0 : i32
    %c0_i32_0 = arith.constant 0 : i32
    return %arg0, %c0_i32, %arg1 : i32, i32, i32
  }
  func.func @transform_1(%arg0: i32, %arg1: i32) -> (i32, i32, i32) {
    %c1_i32 = arith.constant 1 : i32
    %0 = arith.addi %arg1, %c1_i32 : i32
    %c0_i32 = arith.constant 0 : i32
    %c0_i32_0 = arith.constant 0 : i32
    return %arg0, %c0_i32, %0 : i32, i32, i32
  }
  func.func @transform_2(%arg0: i32, %arg1: i32) -> (i32, i32) {
    %c0_i32 = arith.constant 0 : i32
    %c0_i32_0 = arith.constant 0 : i32
    return %c0_i32, %arg1 : i32, i32
  }
  func.func @transform_3(%arg0: i32, %arg1: i32) -> (i32, i32) {
    %c0_i32 = arith.constant 0 : i32
    %c0_i32_0 = arith.constant 0 : i32
    %c0_i32_1 = arith.constant 0 : i32
    return %c0_i32, %c0_i32_0 : i32, i32
  }
  func.func @transform_4(%arg0: i32, %arg1: i32) -> (i32, i32, i32) {
    %c0_i32 = arith.constant 0 : i32
    %c0_i32_0 = arith.constant 0 : i32
    return %arg0, %c0_i32, %arg1 : i32, i32, i32
  }
}

module attributes {stable_mosaic.version = 11 : i64} {
  func.func @_premade_patch_kernel(%arg0: i32, %arg1: i32, %arg2: memref<1x36x256xbf16, #tpu.memory_space<vmem>>, %arg3: memref<64x36xbf16, #tpu.memory_space<vmem>>, %arg4: memref<1x64x256xbf16, #tpu.memory_space<vmem>>) attributes {dimension_semantics = [#tpu.dimension_semantics<parallel>, #tpu.dimension_semantics<parallel>], iteration_bounds = array<i64: 2, 1>, scalar_prefetch = 0 : i64, scratch_operands = 0 : i64, tpu.core_type = #tpu.core_type<tc>, window_params = [{transform_indices = @transform_0, window_bounds = array<i64: 1, 36, 256>}, {pipeline_mode = #tpu.pipeline_mode<synchronous>, transform_indices = @transform_1, window_bounds = array<i64: 64, 36>}, {transform_indices = @transform_2, window_bounds = array<i64: 1, 64, 256>}]} {
    %c0 = arith.constant 0 : index
    %c0_0 = arith.constant 0 : index
    %0 = vector.load %arg3[%c0, %c0_0] : memref<64x36xbf16, #tpu.memory_space<vmem>>, vector<64x36xbf16>
    %c0_1 = arith.constant 0 : index
    %c0_2 = arith.constant 0 : index
    %c0_3 = arith.constant 0 : index
    %1 = vector.load %arg2[%c0_1, %c0_2, %c0_3] : memref<1x36x256xbf16, #tpu.memory_space<vmem>>, vector<1x36x256xbf16>
    %2 = vector.shape_cast %1 : vector<1x36x256xbf16> to vector<36x256xbf16>
    %cst = arith.constant dense<0.000000e+00> : vector<64x256xf32>
    %3 = tpu.matmul %0, %2, %cst {dimension_numbers = #tpu.dot_dimension_numbers<[1], [0], [0], [1], [0, 0, 1, 1], [], []>} : vector<64x36xbf16>, vector<36x256xbf16>, vector<64x256xf32> -> vector<64x256xf32>
    %cst_4 = arith.constant 0.000000e+00 : f32
    %4 = vector.broadcast %cst_4 : f32 to vector<64x256xf32>
    %5 = arith.maximumf %3, %4 : vector<64x256xf32>
    %6 = arith.truncf %5 : vector<64x256xf32> to vector<64x256xbf16>
    %c0_5 = arith.constant 0 : index
    %c0_6 = arith.constant 0 : index
    %c0_7 = arith.constant 0 : index
    %7 = vector.load %arg4[%c0_5, %c0_6, %c0_7] : memref<1x64x256xbf16, #tpu.memory_space<vmem>>, vector<1x64x256xbf16>
    %8 = vector.shape_cast %7 : vector<1x64x256xbf16> to vector<64x256xbf16>
    %9 = vector.shape_cast %6 : vector<64x256xbf16> to vector<1x64x256xbf16>
    tpu.vector_store %arg4[%c0_5, %c0_6, %c0_7], %9 {strides = array<i32>} : memref<1x64x256xbf16, #tpu.memory_space<vmem>>, vector<1x64x256xbf16>,
    return
  }
  func.func @transform_0(%arg0: i32, %arg1: i32) -> (i32, i32, i32) {
    %c0_i32 = arith.constant 0 : i32
    %c0_i32_0 = arith.constant 0 : i32
    return %arg0, %c0_i32, %arg1 : i32, i32, i32
  }
  func.func @transform_1(%arg0: i32, %arg1: i32) -> (i32, i32) {
    %c0_i32 = arith.constant 0 : i32
    %c0_i32_0 = arith.constant 0 : i32
    %c0_i32_1 = arith.constant 0 : i32
    return %c0_i32, %c0_i32_0 : i32, i32
  }
  func.func @transform_2(%arg0: i32, %arg1: i32) -> (i32, i32, i32) {
    %c0_i32 = arith.constant 0 : i32
    %c0_i32_0 = arith.constant 0 : i32
    return %arg0, %c0_i32, %arg1 : i32, i32, i32
  }
}

</mosaic_0001>

<bundles_post_ra>
// kernel: tpu_custom_call.1
= control target key start
LH: loop header
LB: loop body
LE: loop exit
PB: predicated region body
PF: predicated region fallthrough
CT: control target
= control target key end

     0   :  { %9 = vsyncpa [#allocation5], 0  ;;  %s1325_s0 = inlined_call_operand.vmem [shape: bf16[2,4,512], index: 0, kind: input, shape index: {}]   ;;  %s1326_s1 = inlined_call_operand.vmem [shape: bf16[2,4,512], index: 1, kind: input, shape index: {}]   ;;  %s1327_s2 = inlined_call_operand.vmem [shape: bf16[2,256], index: 2, kind: input, shape index: {}]   ;;  %s1328_s3 = inlined_call_operand.vmem [shape: bf16[64,36], index: 3, kind: input, shape index: {}]   ;;  %s1329_s4 = inlined_call_operand.hbm [shape: bf16[2,64,256], index: 4, kind: output, shape index: {}]  }
   0x1   :  { %11 = vsyncpa [#allocation5 + $0x1], 0  ;;  %s1153_s15 = smov 0   ;;  %s1155_s16 = smov 0  }
   0x2   :  { %s1157_s17 = smov 0   ;;  %s1159_s18 = smov 0  }
   0x3   :  { %s1161_s19 = smov 0   ;;  %s1163_s20 = smov 0  }
   0x4 LB: > { %s888_s21 = sadd.s32 4294967295, %s1111_s20   ;;  %s889_s22 = sadd.s32 4294967294, %s1111_s20   ;;  %s1111_s20 = sphi %s1163_s20, %s17_s20   ;;  %s1107_s19 = sphi %s1161_s19, %s1336_s19   ;;  %s1103_s18 = sphi %s1159_s18, %s1335_s18   ;;  %s1099_s17 = sphi %s1157_s17, %s1334_s17   ;;  %s1095_s16 = sphi %s1155_s16, %s1333_s16   ;;  %s1091_s15 = sphi %s1153_s15, %s1332_s15  }
   0x5   : > { %s29_s23 = sadd.s32 1, %s1107_s19  ;;  %s143_s24 = sadd.s32 1, %s1099_s17 }
   0x6   : > { %p31_p0 = scmp.ge.s32.totalorder %s29_s23, 2  ;;  %p153_p1 = scmp.ne.s32.totalorder %s1099_s17, %s1095_s16 }
   0x7   : > { %p154_p2 = scmp.eq.s32.totalorder %s888_s21, 1  ;;  %p159_p3 = scmp.ne.s32.totalorder %s1095_s16, %s1091_s15 }
   0x8   : > { %s1338_s23 = smov (%p31_p0, %s29_s23), 0  ;;  %p160_p5 = scmp.eq.s32.totalorder %s889_s22, 1 }
   0x9   : > { %p1193_p4 = por %p154_p2, %p153_p1  ;;  %s138_s26 = ssub.s32 %s1107_s19, %s1338_s23 }
   0xa   : > { %p893_p6 = scmp.ge.s32.totalorder %s1111_s20, 1  ;;  %p141_p7 = scmp.eq.s32.totalorder %s138_s26, 0 }
   0xb   : > { %p1200_p8 = por %p160_p5, %p159_p3  ;;  %p217_p9 = scmp.lt.s32.totalorder %s1111_s20, 3 }
   0xc   : > { %s1206_s28 = scalar_select %p141_p7, %s1099_s17, %s143_s24  }
   0xd   : > { %p218_p10 = pnand %p893_p6, %p217_p9 }
   0xe   : > { %p262_p11 = scmp.lt.s32.totalorder (!%p218_p10), %s1103_s18, 1  ;;  %s1113_s14 = smov (!%p218_p10), 2  }
   0xf   : > { %221 = sbr.rel (%p218_p10) target bundleno = 559 (0x22f), region = 36  ;;  %s1114_s21 = smov (!%p218_p10), 18  }
  0x10   : > { %s1115_s22 = smov (!%p218_p10), 34   ;;  %s1116_s24 = smov (!%p218_p10), 16  }
  0x11   : > { %s1117_s26 = smov (!%p218_p10), 32   ;;  %s1118_s29 = smov (!%p218_p10), 111  }
  0x12   : > { %s1119_s30 = smov (!%p218_p10), 110   ;;  %s1122_s7 = smov (!%p218_p10), 95  }
  0x13   : > { %s1123_s8 = smov (!%p218_p10), 94  }
  0x14   : > { %v295_v0 = vld [vmem:[%s1327_s2] sm:$0x3]  ;;  %s263_s5 = scalar_select %p262_p11, %s1103_s18, 1  ;;  %vm293_vm0 = vcmask 271360   ;;  %vm313_vm1 = vcmask 1043456   ;;  %vm368_vm2 = vcmask 15360  }
  0x15   : > { %298 = vst [vmem:[#allocation1] ss:$9 sm:$0xff] %v295_v0  ;;  %vm406_vm3 = vcmask 130048   ;;  %vm464_vm4 = vcmask 146432   ;;  %vm504_vm5 = vcmask 261120   ;;  %vm561_vm6 = vcmask 277504  }
  0x16   : > { %s944_s6 = sshll.u32 %s263_s5, 3  ;;  %s1120_s5 = smov 96   ;;  %vm454_vm7 = vcmask 908288   ;;  %vm532_vm8 = vcmask 785408   ;;  %vm494_vm9 = vcmask 900096   ;;  %vm551_vm10 = vcmask 777216  }
  0x17   : > { %s269_s9 = scalar_lea.vmem %s1325_s0, %s944_s6  ;;  %s946_s10 = sadd.s32 4, %s944_s6  ;;  %vm589_vm11 = vcmask 769024   ;;  %vm436_vm12 = vcmask 916480   ;;  %vm341_vm13 = vcmask 1039360   ;;  %vm664_vm14 = vcmask 1041408  }
  0x18   : > { %s280_s13 = scalar_lea.vmem %s1326_s1, %s946_s10  ;;  %v290_v1 = vld [vmem:[%s269_s9] sm:$0xf]  ;;  %s1121_s6 = smov 127   ;;  %vm396_vm15 = vcmask 1031168  }
  0x19   : > { %291 = vst [vmem:[#allocation2] sm:$0xf] %v290_v1  ;;  %v292_v2 = vld [vmem:[%s280_s13] sm:$0x3]  ;;  %s1124_s9 = smov 112   ;;  %s1125_s10 = smov 126  }
  0x1a   : > { %294 = vst.msk [vmem:[#allocation2 + $0x4] sm:$0x3] %vm293_vm0, %v292_v2  ;;  %vm651_vm0 = vcmask 293888  }
  0x1c   : > { %v299_v3 = vld [vmem:[#allocation1] sm:$0xff]  ;;  %v300_v4 = vld [vmem:[#allocation1 + $0x9] sm:$0xff] }
  0x1d   : > { %v301_v5 = vpack.i.b16 %v299_v3, %v299_v3  ;;  %v304_v6 = vpack.i.b16 %v300_v4, %v300_v4 }
  0x1f   : > { %v303_v7 = vperm.slane %v301_v5, 0  ;;  %v306_v8 = vperm.slane %v304_v6, 0 }
  0x20   : > { %v296_v11 = vld [vmem:[#allocation2] sm:$0xf] }
  0x21   : > { %v308_v9 = vunpack.c.l.bf16 %v303_v7  ;;  %v309_v10 = vunpack.c.l.bf16 %v306_v8  ;;  %v307_v12 = vunpack.c.l.bf16 %v296_v11  ;;  %v325_v16 = vld [vmem:[#allocation2] sm:$0x3f] }
  0x22   : > { %v345_v33 = vld [vmem:[#allocation2] sm:$0x3f] }
  0x23   : > { %v312_v13 = vrot.slane %v309_v10, 4  ;;  %v358_v34 = vunpack.c.h.bf16 %v345_v33  ;;  %v357_v35 = vunpack.c.l.bf16 %v345_v33  ;;  %v400_v41 = vld [vmem:[#allocation2] sm:$0x3f] }
  0x24   : > { %v402_v42 = vunpack.c.h.bf16 %v400_v41  ;;  %v401_v43 = vunpack.c.l.bf16 %v400_v41  ;;  %v458_v50 = vld [vmem:[#allocation2] sm:$0x3f] }
  0x25   : > { %v314_v14 = vsel %vm313_vm1, %v308_v9, %v312_v13  ;;  %v460_v54 = vunpack.c.h.bf16 %v458_v50  ;;  %v440_v57 = vld [vmem:[#allocation2] sm:$0x3f] }
  0x26   : > { %v316_v15 = vmul.f32 %v314_v14, %v307_v12  ;;  %v498_v58 = vld [vmem:[#allocation2] sm:$0x3f] }
  0x27   : > { %v500_v63 = vunpack.c.h.bf16 %v498_v58  ;;  %v555_v5 = vld [vmem:[#allocation2] sm:$0x3f]  ;;  %v499_v11 = vunpack.c.l.bf16 %v498_v58 }
  0x28   : > { %318 = vst [vmem:[#allocation1] ss:$2 sm:$0xff] %v316_v15  ;;  %v557_v10 = vunpack.c.h.bf16 %v555_v5 }
  0x2f   : > { %v1220_v17 = vld.sshfl [vmem:[#allocation1] sm:$0xff pattern:$0x75316420]  ;;  %v1222_v18 = vld.sshfl [vmem:[#allocation1 + $0x8] sm:$0xff pattern:$0x75316420] }
  0x30   : > { %328 = vst [vmem:[#allocation1 + $0x1] ss:$2 sm:$0xff] %v325_v16 }
  0x37   : > { %v1224_v19 = vld.sshfl [vmem:[#allocation1] sm:$0xff pattern:$0x75643120]  ;;  %v1226_v20 = vld.sshfl [vmem:[#allocation1 + $0x8] sm:$0xff pattern:$0x75643120] }
  0x38   : > { %346 = vst [vmem:[#allocation1] ss:$9 sm:$0xff] %v295_v0  ;;  %v459_v0 = vunpack.c.l.bf16 %v458_v50 }
  0x3f   : > { %v347_v21 = vld [vmem:[#allocation1] sm:$0xff]  ;;  %v348_v22 = vld [vmem:[#allocation1 + $0x9] sm:$0xff] }
  0x40   : > { %v349_v23 = vshrl.u32 %v347_v21, 16  ;;  %v353_v24 = vshrl.u32 %v348_v22, 16 }
  0x42   : > { %v350_v25 = vpack.i.b16 %v349_v23, %v349_v23  ;;  %v354_v26 = vpack.i.b16 %v353_v24, %v353_v24 }
  0x44   : > { %v352_v27 = vperm.slane %v350_v25, 0  ;;  %v356_v28 = vperm.slane %v354_v26, 0  ;;  %v536_v26 = vld [vmem:[#allocation2] sm:$0x3f] }
  0x46   : > { %v359_v29 = vunpack.c.l.bf16 %v352_v27  ;;  %v360_v30 = vunpack.c.l.bf16 %v356_v28 }
  0x48   : > { %v363_v31 = vrot.slane %v360_v30, 4 }
  0x4a   : > { %v364_v32 = vsel %vm313_vm1, %v359_v29, %v363_v31 }
  0x4b   : > { %365 = vrot.lane.b32.xlu0 %v364_v32, %s1113_s14  ;;  %461 = vrot.lane.b32.xlu1 %v364_v32, %s1114_s21 }
  0x4c   : > { %558 = vrot.lane.b32.xlu2 %v364_v32, %s1115_s22  ;;  %v556_v32 = vunpack.c.l.bf16 %v555_v5  ;;  %s1053_s22 = scalar_lea.hbm %s1329_s4, 128 }
  0x53   : > { %403 = vrot.lane.b32.xlu0 %v314_v14, %s1116_s24  ;;  %501 = vrot.lane.b32.xlu1 %v314_v14, %s1117_s26 }
  0xa6   : > { %v559_v8 = vpop.permute.xlu2 %558 }
  0xa7   : > { %v560_v14 = vrot.slane %v559_v8, 4 }
  0xa9   : > { %v566_v15 = vmul.f32 %v560_v14, %v557_v10  ;;  %v562_v33 = vsel %vm561_vm6, %v560_v14, %v559_v8 }
  0xbd   : > { %v366_v36 = vpop.permute.xlu0 %365  ;;  %v462_v51 = vpop.permute.xlu1 %461 }
  0xbe   : > { %v367_v37 = vrot.slane %v366_v36, 4  ;;  %v463_v55 = vrot.slane %v462_v51, 4 }
  0xc0   : > { %v369_v38 = vsel %vm368_vm2, %v367_v37, %v366_v36  ;;  %v373_v39 = vmul.f32 %v367_v37, %v358_v34  ;;  %v469_v56 = vmul.f32 %v463_v55, %v460_v54  ;;  %v465_v1 = vsel %vm464_vm4, %v463_v55, %v462_v51 }
  0xc1   : > { %v372_v40 = vmul.f32 %v369_v38, %v357_v35  ;;  %v468_v4 = vmul.f32 %v465_v1, %v459_v0  ;;  %v565_v35 = vmul.f32 %v562_v33, %v556_v32 }
  0xc2   : > { %378 = vst [vmem:[#allocation1 + $0x10] ss:$2 sm:$0xff] %v373_v39 }
  0xc3   : > { %376 = vst [vmem:[#allocation1] ss:$2 sm:$0xff] %v372_v40 }
  0xc5   : > { %v404_v44 = vpop.permute.xlu0 %403  ;;  %v502_v62 = vpop.permute.xlu1 %501 }
  0xc6   : > { %v405_v45 = vrot.slane %v404_v44, 4  ;;  %v503_v2 = vrot.slane %v502_v62, 4 }
  0xc8   : > { %v407_v46 = vsel %vm406_vm3, %v405_v45, %v404_v44  ;;  %v411_v47 = vmul.f32 %v405_v45, %v402_v42  ;;  %v509_v3 = vmul.f32 %v503_v2, %v500_v63  ;;  %v505_v13 = vsel %vm504_vm5, %v503_v2, %v502_v62 }
  0xc9   : > { %v1229_v48 = vld.sshfl [vmem:[#allocation1 + $0x10] sm:$0xff pattern:$0x75316420]  ;;  %v410_v49 = vmul.f32 %v407_v46, %v401_v43  ;;  %v508_v16 = vmul.f32 %v505_v13, %v499_v11 }
  0xca   : > { %v1231_v52 = vld.sshfl [vmem:[#allocation1] sm:$0xff pattern:$0x75316420]  ;;  %v1233_v53 = vld.sshfl [vmem:[#allocation1 + $0x8] sm:$0xff pattern:$0x75316420]  ;;  %v386_v44 = vpack.c.bf16 %v1229_v48, %v1229_v48  ;;  %v323_v48 = vpack.c.bf16 %v1222_v18, %v1220_v17 }
  0xcb   : > { %414 = vst [vmem:[#allocation1] ss:$2 sm:$0xff] %v410_v49  ;;  %v385_v43 = vpack.c.bf16 %v1233_v53, %v1231_v52 }
  0xcc   : > { %416 = vst [vmem:[#allocation1 + $0x10] ss:$2 sm:$0xff] %v411_v47 }
  0xcd   : > { %324 = vst [vmem:[#allocation3] sm:$0x33] %v323_v48 }
  0xd2   : > { %v1235_v59 = vld.sshfl [vmem:[#allocation1] sm:$0xff pattern:$0x75316420]  ;;  %v1237_v60 = vld.sshfl [vmem:[#allocation1 + $0x8] sm:$0xff pattern:$0x75316420] }
  0xd3   : > { %v1239_v61 = vld.sshfl [vmem:[#allocation1 + $0x10] sm:$0xff pattern:$0x75316420]  ;;  %442 = vst [vmem:[#allocation1] ss:$2 sm:$0xff] %v440_v57  ;;  %v423_v39 = vpack.c.bf16 %v1237_v60, %v1235_v59 }
  0xd4   : > { %474 = vst [vmem:[#allocation1 + $0x10] ss:$2 sm:$0xff] %v469_v56  ;;  %v424_v45 = vpack.c.bf16 %v1239_v61, %v1239_v61 }
  0xd6   : > { %v428_v46 = vrot.slane %v424_v45, 6 }
  0xda   : > { %v443_v6 = vld.sshfl [vmem:[#allocation1] sm:$0xff pattern:$0x75643120]  ;;  %v445_v7 = vld.sshfl [vmem:[#allocation1 + $0x8] sm:$0xff pattern:$0x75643120] }
  0xdb   : > { %447 = vrot.lane.b32.xlu1 %v443_v6, %s1118_s29  ;;  %v477_v9 = vld.sshfl [vmem:[#allocation1 + $0x10] sm:$0xff pattern:$0x75316420]  ;;  %449 = vrot.lane.b32.xlu2 %v445_v7, %s1118_s29  ;;  %472 = vst [vmem:[#allocation1] ss:$2 sm:$0xff] %v468_v4  ;;  %s258_s29 = sand.u32 1, %s1095_s16  }
  0xdc   : > { %514 = vst [vmem:[#allocation1 + $0x10] ss:$2 sm:$0xff] %v509_v3  ;;  %v482_v12 = vpack.c.bf16 %v477_v9, %v477_v9 }
  0xde   : > { %v486_v21 = vrot.slane %v482_v12, 6 }
  0xe2   : > { %v475_v22 = vld.sshfl [vmem:[#allocation1] sm:$0xff pattern:$0x75316420]  ;;  %v476_v23 = vld.sshfl [vmem:[#allocation1 + $0x8] sm:$0xff pattern:$0x75316420] }
  0xe3   : > { %489 = vrot.lane.b32.xlu1 %v486_v21, %s1119_s30  ;;  %v517_v24 = vld.sshfl [vmem:[#allocation1 + $0x10] sm:$0xff pattern:$0x75316420]  ;;  %512 = vst [vmem:[#allocation1] ss:$2 sm:$0xff] %v508_v16  ;;  %v481_v27 = vpack.c.bf16 %v476_v23, %v475_v22 }
  0xe4   : > { %v522_v25 = vpack.c.bf16 %v517_v24, %v517_v24  ;;  %571 = vst [vmem:[#allocation1 + $0x10] ss:$2 sm:$0xff] %v566_v15 }
  0xe5   : > { %v485_v31 = vrot.slane %v481_v27, 6 }
  0xe6   : > { %527 = vrot.lane.b32.xlu0 %v522_v25, %s1120_s5 }
  0xea   : > { %v515_v28 = vld.sshfl [vmem:[#allocation1] sm:$0xff pattern:$0x75316420]  ;;  %v516_v29 = vld.sshfl [vmem:[#allocation1 + $0x8] sm:$0xff pattern:$0x75316420] }
  0xeb   : > { %335 = vrot.lane.b32.xlu1 %v1226_v20, %s1121_s6  ;;  %v521_v30 = vpack.c.bf16 %v516_v29, %v515_v28  ;;  %539 = vst [vmem:[#allocation1 + $0x1] ss:$2 sm:$0xff] %v536_v26  ;;  %v574_v34 = vld.sshfl [vmem:[#allocation1 + $0x10] sm:$0xff pattern:$0x75316420]  ;;  %v427_v20 = vrot.slane %v423_v39, 6 }
  0xec   : > { %v579_v37 = vpack.c.bf16 %v574_v34, %v574_v34 }
  0xed   : > { %525 = vrot.lane.b32.xlu2 %v521_v30, %s1120_s5 }
  0xee   : > { %487 = vrot.lane.b32.xlu0 %v485_v31, %s1119_s30  ;;  %s894_s30 = sshll.u32 %s258_s29, 6 }
  0xef   : > { %s1276_s5 = scalar_lea.vmem [#allocation4], %s894_s30 }
  0xf2   : > { %v540_v36 = vld.sshfl [vmem:[#allocation1] sm:$0xff pattern:$0x75643120]  ;;  %v542_v38 = vld.sshfl [vmem:[#allocation1 + $0x8] sm:$0xff pattern:$0x75643120] }
  0xf3   : > { %544 = vrot.lane.b32.xlu1 %v540_v36, %s1122_s7  ;;  %569 = vst [vmem:[#allocation1] ss:$2 sm:$0xff] %v565_v35 }
  0xf5   : > { %546 = vrot.lane.b32.xlu2 %v542_v38, %s1122_s7 }
  0xf6   : > { %584 = vrot.lane.b32.xlu0 %v579_v37, %s1123_s8 }
  0xfa   : > { %v572_v40 = vld.sshfl [vmem:[#allocation1] sm:$0xff pattern:$0x75316420]  ;;  %v573_v41 = vld.sshfl [vmem:[#allocation1 + $0x8] sm:$0xff pattern:$0x75316420] }
  0xfb   : > { %429 = vrot.lane.b32.xlu1 %v427_v20, %s1124_s9  ;;  %v578_v42 = vpack.c.bf16 %v573_v41, %v572_v40 }
  0xfd   : > { %582 = vrot.lane.b32.xlu2 %v578_v42, %s1123_s8 }
  0xfe   : > { %333 = vrot.lane.b32.xlu0 %v1224_v19, %s1121_s6  ;;  %s955_s6 = sshll.u32 %s1103_s18, 6  ;;  %s762_s18 = scalar_lea.sflag [#allocation5], %s258_s29 }
 0x105   : > { %389 = vrot.lane.b32.xlu2 %v385_v43, %s1125_s10 }
 0x106   : > { %391 = vrot.lane.b32.xlu0 %v386_v44, %s1125_s10  ;;  %s776_s10 = sshll.u32 %s1276_s5, 4  ;;  %s777_s10 = int_to_ptr.vmem [resolvable:$true] %s776_s10 }
 0x10d   : > { %431 = vrot.lane.b32.xlu2 %v428_v46, %s1124_s9  ;;  %s775_s9 = scalar_lea.hbm %s1329_s4, %s955_s6 }
 0x10e   : > { %s778_s11 = sshll.u32 %s775_s9, 4  ;;  %s779_s11 = int_to_ptr.hbm [resolvable:$true] %s778_s11 }
 0x10f   : > { %s1047_s12 = sshra.s32 %s779_s11, 4  ;;  %s1048_s12 = int_to_ptr.hbm [resolvable:$true] %s1047_s12 }
 0x110   : > { %s1049_s13 = scalar_lea.hbm %s1048_s12, 64  ;;  %p1054_p1 = scmp.lt.s32.totalorder %s1048_s12, %s1329_s4 }
 0x111   : > { %p1050_p12 = scmp.ne.s32.totalorder %s1048_s12, %s1049_s13  ;;  %p1055_p2 = scmp.lt.s32.totalorder %s1053_s22, %s1049_s13 }
 0x113   : > { %p1051_p13 = pnand %p1050_p12, %p1193_p4  ;;  %p1056_p3 = por %p1055_p2, %p1054_p1 }
 0x115   : > { %p1052_p0 = pneg %p1051_p13 }
 0x117   : > { %p1057_p5 = pnand %p1056_p3, %p1052_p0 }
 0x135   : > { %v450_v47 = vpop.permute.xlu2 %449 }
 0x136   : > { %v452_v50 = vrot.slane %v450_v47, 4 }
 0x147   : > { %v526_v49 = vpop.permute.xlu2 %525 }
 0x148   : > { %v529_v58 = vrot.slane %v526_v49, 4 }
 0x14d   : > { %v448_v51 = vpop.permute.xlu1 %447 }
 0x14e   : > { %v451_v19 = vrot.slane %v448_v51, 4 }
 0x14f   : > { %v547_v54 = vpop.permute.xlu2 %546 }
 0x150   : > { %v453_v52 = vsel %vm313_vm1, %v451_v19, %v452_v50  ;;  %v549_v4 = vrot.slane %v547_v54, 4  ;;  %v947_v19 = vld [vmem:[%s1328_s3] sm:$0xff]  ;;  %v949_v54 = vld [vmem:[%s1328_s3 + $0x10] sm:$0xff] }
 0x151   : > { %v455_v53 = vsel %vm454_vm7, %v448_v51, %v453_v52  ;;  %v948_v52 = vld [vmem:[%s1328_s3 + $0x8] sm:$0xff] }
 0x152   : > { %457 = vst [vmem:[#allocation3 + $0x10] sm:$0x33] %v455_v53  ;;  %v950_v53 = vld [vmem:[%s1328_s3 + $0x18] sm:$0xff] }
 0x155   : > { %v490_v55 = vpop.permute.xlu1 %489 }
 0x156   : > { %v492_v0 = vrot.slane %v490_v55, 4 }
 0x157   : > { %v583_v56 = vpop.permute.xlu2 %582 }
 0x158   : > { %v528_v57 = vpop.permute.xlu0 %527  ;;  %v586_v8 = vrot.slane %v583_v56, 4 }
 0x159   : > { %v530_v59 = vrot.slane %v528_v57, 4 }
 0x15b   : > { %v531_v60 = vsel %vm313_vm1, %v529_v58, %v530_v59 }
 0x15c   : > { %v533_v61 = vsel %vm532_vm8, %v526_v49, %v531_v60 }
 0x15d   : > { %535 = vst [vmem:[#allocation3 + $0x18] sm:$0x33] %v533_v61  ;;  %v336_v62 = vpop.permute.xlu1 %335 }
 0x15e   : > { %v338_v23 = vrot.slane %v336_v62, 4 }
 0x15f   : > { %v390_v2 = vpop.permute.xlu2 %389 }
 0x160   : > { %v488_v63 = vpop.permute.xlu0 %487  ;;  %v393_v34 = vrot.slane %v390_v2, 4 }
 0x161   : > { %v491_v1 = vrot.slane %v488_v63, 4 }
 0x163   : > { %v493_v3 = vsel %vm313_vm1, %v491_v1, %v492_v0 }
 0x164   : > { %v495_v17 = vsel %vm494_vm9, %v488_v63, %v493_v3 }
 0x165   : > { %497 = vst [vmem:[#allocation3 + $0x10] sm:$0xcc] %v495_v17  ;;  %v545_v18 = vpop.permute.xlu1 %544 }
 0x166   : > { %v548_v5 = vrot.slane %v545_v18, 4 }
 0x167   : > { %v432_v12 = vpop.permute.xlu2 %431 }
 0x168   : > { %v550_v6 = vsel %vm313_vm1, %v548_v5, %v549_v4  ;;  %v585_v7 = vpop.permute.xlu0 %584  ;;  %v434_v15 = vrot.slane %v432_v12, 4 }
 0x169   : > { %v552_v9 = vsel %vm551_vm10, %v545_v18, %v550_v6  ;;  %v587_v10 = vrot.slane %v585_v7, 4 }
 0x16a   : > { %554 = vst [vmem:[#allocation3 + $0x18] sm:$0xcc] %v552_v9 }
 0x16b   : > { %v588_v11 = vsel %vm313_vm1, %v586_v8, %v587_v10 }
 0x16c   : > { %v590_v13 = vsel %vm589_vm11, %v583_v56, %v588_v11  ;;  %v925_v40 = vld [vmem:[#allocation3 + $0x10] sm:$0xf]  ;;  %v953_v43 = vld [vmem:[#allocation3 + $0x14] sm:$0xf] }
 0x16d   : > { %592 = vst [vmem:[#allocation3 + $0x20] sm:$0x33] %v590_v13  ;;  %v430_v14 = vpop.permute.xlu1 %429 }
 0x16e   : > { %v433_v16 = vrot.slane %v430_v14, 4 }
 0x170   : > { %v435_v21 = vsel %vm313_vm1, %v433_v16, %v434_v15  ;;  %v334_v22 = vpop.permute.xlu0 %333 }
 0x171   : > { %v437_v24 = vsel %vm436_vm12, %v430_v14, %v435_v21  ;;  %v337_v25 = vrot.slane %v334_v22, 4  ;;  %v954_v38 = vld [vmem:[#allocation3 + $0x14] sm:$0xf0]  ;;  %v927_v39 = vld [vmem:[#allocation3 + $0x18] sm:$0xf0] }
 0x172   : > { %439 = vst [vmem:[#allocation3 + $0x8] sm:$0xcc] %v437_v24  ;;  %v926_v42 = vor.u32 %v954_v38, %v925_v40  ;;  %v930_v44 = vor.u32 %v953_v43, %v927_v39 }
 0x173   : > { %v340_v26 = vsel %vm313_vm1, %v337_v25, %v338_v23 }
 0x174   : > { %v342_v27 = vsel %vm341_vm13, %v334_v22, %v340_v26  ;;  %v605_v28 = vld [vmem:[#allocation3 + $0x20] sm:$0x33] }
 0x175   : > { %344 = vst [vmem:[#allocation3] sm:$0xcc] %v342_v27  ;;  %v639_v29 = vunpack.c.l.b16 %v605_v28  ;;  %v640_v30 = vunpack.c.h.b16 %v605_v28 }
 0x177   : > { %v645_v31 = vpack.c.b16 %v639_v29, %v639_v29  ;;  %v646_v32 = vpack.c.b16 %v640_v30, %v640_v30 }
 0x178   : > { %v392_v33 = vpop.permute.xlu0 %391 }
 0x179   : > { %v394_v35 = vrot.slane %v392_v33, 4  ;;  %v666_v36 = vsel %vm664_vm14, %v645_v31, 0  ;;  %v669_v37 = vsel %vm664_vm14, %v646_v32, 0 }
 0x17a   : > { %676 = vmatpush.bf16.msra.mxu0 %v666_v36  ;;  %957 = vmatpush.bf16.msra.mxu2 %v666_v36 }
 0x17b   : > { %v395_v20 = vsel %vm313_vm1, %v393_v34, %v394_v35  ;;  %705 = vmatpush.bf16.msra.mxu1 %v669_v37  ;;  %960 = vmatpush.bf16.msra.mxu3 %v669_v37 }
 0x17c   : > { %v397_v41 = vsel %vm396_vm15, %v390_v2, %v395_v20  ;;  %v917_v45 = vld [vmem:[#allocation3] sm:$0xf]  ;;  %v951_v47 = vld [vmem:[#allocation3 + $0x4] sm:$0xf] }
 0x17d   : > { %399 = vst [vmem:[#allocation3 + $0x8] sm:$0x33] %v397_v41 }
 0x17e   : > { %677 = vmatpush.bf16.msra.mxu0 %v926_v42  ;;  %958 = vmatpush.bf16.msra.mxu2 %v926_v42 }
 0x17f   : > { %706 = vmatpush.bf16.msra.mxu1 %v930_v44  ;;  %961 = vmatpush.bf16.msra.mxu3 %v930_v44 }
 0x184   : > { %v952_v46 = vld [vmem:[#allocation3 + $0x4] sm:$0xf0]  ;;  %v919_v49 = vld [vmem:[#allocation3 + $0x8] sm:$0xf0] }
 0x185   : > { %v918_v50 = vor.u32 %v952_v46, %v917_v45  ;;  %v922_v51 = vor.u32 %v951_v47, %v919_v49 }
 0x187   : > { %678 = vmatpush.bf16.msra.mxu0 %v918_v50  ;;  %959 = vmatpush.bf16.msra.mxu2 %v918_v50 }
 0x188   : > { %707 = vmatpush.bf16.msra.mxu1 %v922_v51  ;;  %962 = vmatpush.bf16.msra.mxu3 %v922_v51 }
 0x18a   : > { %931 = vmatmul.msk.bf16.vlgmr.msra.gmra.mxu0 %vm651_vm0, %v947_v19  ;;  %933 = vmatmul.msk.bf16.vlgmr.msra.gmra.mxu2 %vm651_vm0, %v949_v54 }
 0x18b   : > { %935 = vmatmul.msk.bf16.vlgmr.msra.gmra.mxu1 %vm651_vm0, %v947_v19  ;;  %937 = vmatmul.msk.bf16.vlgmr.msra.gmra.mxu3 %vm651_vm0, %v949_v54 }
 0x19a   : > { %932 = vmatmul.msk.bf16.gmra.mxu0 %vm651_vm0, %v948_v52  ;;  %934 = vmatmul.msk.bf16.gmra.mxu2 %vm651_vm0, %v950_v53 }
 0x19b   : > { %936 = vmatmul.msk.bf16.gmra.mxu1 %vm651_vm0, %v948_v52  ;;  %938 = vmatmul.msk.bf16.gmra.mxu3 %vm651_vm0, %v950_v53 }
 0x207   : > { %v680_v48 = vpop.f32.mrf.mxu0 }
 0x208   : > { %v729_v55 = vmax.f32 %v680_v48, 0.0  ;;  %v709_v56 = vpop.f32.mrf.mxu1 }
 0x209   : > { %v730_v57 = vmax.f32 %v709_v56, 0.0 }
 0x20b   : > { %v745_v58 = vpack.c.bf16 %v730_v57, %v729_v55 }
 0x20d   : > { %753 = vst [vmem:[%s1276_s5] sm:$0xff] %v745_v58  ;;  %v690_v59 = vpop.f32.mrf.mxu2 }
 0x20e   : > { %v737_v60 = vmax.f32 %v690_v59, 0.0  ;;  %v719_v61 = vpop.f32.mrf.mxu3 }
 0x20f   : > { %v738_v62 = vmax.f32 %v719_v61, 0.0  ;;  %v682_v63 = vpop.f32.mrf.mxu0 }
 0x210   : > { %v731_v0 = vmax.f32 %v682_v63, 0.0  ;;  %v711_v1 = vpop.f32.mrf.mxu1 }
 0x211   : > { %v749_v2 = vpack.c.bf16 %v738_v62, %v737_v60  ;;  %v732_v3 = vmax.f32 %v711_v1, 0.0 }
 0x213   : > { %757 = vst [vmem:[%s1276_s5 + $0x20] sm:$0xff] %v749_v2  ;;  %v746_v17 = vpack.c.bf16 %v732_v3, %v731_v0 }
 0x215   : > { %754 = vst [vmem:[%s1276_s5 + $0x8] sm:$0xff] %v746_v17  ;;  %v692_v18 = vpop.f32.mrf.mxu2 }
 0x216   : > { %v739_v4 = vmax.f32 %v692_v18, 0.0  ;;  %v721_v5 = vpop.f32.mrf.mxu3 }
 0x217   : > { %v740_v6 = vmax.f32 %v721_v5, 0.0  ;;  %v685_v7 = vpop.f32.mrf.mxu0 }
 0x218   : > { %v733_v8 = vmax.f32 %v685_v7, 0.0  ;;  %v714_v9 = vpop.f32.mrf.mxu1 }
 0x219   : > { %v750_v10 = vpack.c.bf16 %v740_v6, %v739_v4  ;;  %v734_v11 = vmax.f32 %v714_v9, 0.0 }
 0x21b   : > { %758 = vst [vmem:[%s1276_s5 + $0x28] sm:$0xff] %v750_v10  ;;  %v747_v12 = vpack.c.bf16 %v734_v11, %v733_v8 }
 0x21d   : > { %755 = vst [vmem:[%s1276_s5 + $0x10] sm:$0xff] %v747_v12  ;;  %v695_v13 = vpop.f32.mrf.mxu2 }
 0x21e   : > { %v741_v14 = vmax.f32 %v695_v13, 0.0  ;;  %v724_v15 = vpop.f32.mrf.mxu3 }
 0x21f   : > { %v742_v16 = vmax.f32 %v724_v15, 0.0  ;;  %v687_v21 = vpop.f32.mrf.mxu0 }
 0x220   : > { %v735_v22 = vmax.f32 %v687_v21, 0.0  ;;  %v716_v23 = vpop.f32.mrf.mxu1 }
 0x221   : > { %v751_v24 = vpack.c.bf16 %v742_v16, %v741_v14  ;;  %v736_v25 = vmax.f32 %v716_v23, 0.0 }
 0x223   : > { %759 = vst [vmem:[%s1276_s5 + $0x30] sm:$0xff] %v751_v24  ;;  %v748_v26 = vpack.c.bf16 %v736_v25, %v735_v22 }
 0x225   : > { %756 = vst [vmem:[%s1276_s5 + $0x18] sm:$0xff] %v748_v26  ;;  %v697_v27 = vpop.f32.mrf.mxu2 }
 0x226   : > { %v743_v28 = vmax.f32 %v697_v27, 0.0  ;;  %v726_v29 = vpop.f32.mrf.mxu3 }
 0x227   : > { %v744_v30 = vmax.f32 %v726_v29, 0.0 }
 0x229   : > { %v752_v31 = vpack.c.bf16 %v744_v30, %v743_v28 }
 0x22b   : > { %760 = vst [vmem:[%s1276_s5 + $0x38] sm:$0xff] %v752_v31 }
 0x22c   : > { %1060 = shalt.err (!%p1057_p5)
}
 0x22d   : > { %s1126_s29 = smov 128   ;;  %s1127_s30 = smov 8  }
 0x22e   : > { %963 = dma.vmem_to_hbm [thread:$0]  (%p1193_p4), %s777_s10, 1024, %s779_s11, %s762_s18, %s1126_s29, %s1126_s29, %s1127_s30  }
 0x22f PF: > { %p969_p6 = scmp.ge.s32.totalorder %s1111_s20, 2  ;;  %s793_s5 = sand.u32 1, %s1091_s15  }
 0x230   : > { %s794_s6 = scalar_lea.sflag [#allocation5], %s793_s5 }
 0x231   : > { %p966_p7 = pnand %p969_p6, %p1200_p8 }
 0x233   : > { %p967_p9 = pneg %p966_p7 }
 0x235   : > { %1086 = dma.done.wait (%p967_p9), %s794_s6, 1024  }
 0x236   : > { %1088 = vsyncadd (%p967_p9), %s794_s6, 4294966272  ;;  %s17_s20 = sadd.s32 1, %s1111_s20   ;;  %s1332_s15 = smov %s1095_s16 }
 0x237   : > { %p14_p10 = scmp.ge.s32.totalorder %s17_s20, 4   ;;  %s1333_s16 = smov %s1099_s17 }
 0x238   : > { %s1334_s17 = smov %s1206_s28  ;;  %s1335_s18 = smov %s1107_s19 }
 0x239   : > { %s1336_s19 = smov %s1338_s23  ;;  %16 = sbr.rel (!%p14_p10) target bundleno = 4 (0x4), region = 84 }
 0x23e   :  { %800 = vsyncpa [#allocation5], 1 }
 0x23f   :  { %802 = vsyncpa [#allocation5 + $0x1], 1 }

// kernel: tpu_custom_call.1
= control target key start
LH: loop header
LB: loop body
LE: loop exit
PB: predicated region body
PF: predicated region fallthrough
CT: control target
= control target key end

     0   :  { %7 = vsyncpa [#allocation3], 0  ;;  %s785_s0 = inlined_call_operand.vmem [shape: bf16[2,36,256], index: 0, kind: input, shape index: {}]   ;;  %s786_s1 = inlined_call_operand.vmem [shape: bf16[64,36], index: 1, kind: input, shape index: {}]   ;;  %s787_s2 = inlined_call_operand.hbm [shape: bf16[2,64,256], index: 2, kind: output, shape index: {}]  }
   0x1   :  { %9 = vsyncpa [#allocation3 + $0x1], 0  ;;  %s661_s9 = smov 0   ;;  %s663_s10 = smov 0  }
   0x2   :  { %s665_s11 = smov 0   ;;  %s667_s12 = smov 0  }
   0x3   :  { %s669_s13 = smov 0   ;;  %s671_s14 = smov 0  }
   0x4 LB: > { %s439_s15 = sadd.s32 4294967295, %s642_s14   ;;  %s440_s16 = sadd.s32 4294967294, %s642_s14   ;;  %s642_s14 = sphi %s671_s14, %s15_s14   ;;  %s638_s13 = sphi %s669_s13, %s794_s13   ;;  %s634_s12 = sphi %s667_s12, %s793_s12   ;;  %s630_s11 = sphi %s665_s11, %s792_s11   ;;  %s626_s10 = sphi %s663_s10, %s791_s10   ;;  %s622_s9 = sphi %s661_s9, %s790_s9  }
   0x5   : > { %s27_s17 = sadd.s32 1, %s638_s13  ;;  %s85_s18 = sadd.s32 1, %s630_s11 }
   0x6   : > { %p29_p0 = scmp.ge.s32.totalorder %s27_s17, 2  ;;  %p95_p1 = scmp.ne.s32.totalorder %s630_s11, %s626_s10 }
   0x7   : > { %p96_p2 = scmp.eq.s32.totalorder %s439_s15, 1  ;;  %p101_p3 = scmp.ne.s32.totalorder %s626_s10, %s622_s9 }
   0x8   : > { %s796_s17 = smov (%p29_p0, %s27_s17), 0  ;;  %p102_p5 = scmp.eq.s32.totalorder %s440_s16, 1 }
   0x9   : > { %p701_p4 = por %p96_p2, %p95_p1  ;;  %s80_s20 = ssub.s32 %s638_s13, %s796_s17 }
   0xa   : > { %p443_p6 = scmp.ge.s32.totalorder %s642_s14, 1  ;;  %p83_p7 = scmp.eq.s32.totalorder %s80_s20, 0 }
   0xb   : > { %p708_p8 = por %p102_p5, %p101_p3  ;;  %p136_p9 = scmp.lt.s32.totalorder %s642_s14, 3 }
   0xc   : > { %s714_s22 = scalar_select %p83_p7, %s630_s11, %s85_s18  }
   0xd   : > { %p137_p10 = pnand %p443_p6, %p136_p9 }
   0xe   : > { %p163_p11 = scmp.lt.s32.totalorder (!%p137_p10), %s634_s12, 1  ;;  %s159_s8 = sand.u32 (!%p137_p10), 1, %s626_s10  }
   0xf   : > { %140 = sbr.rel (%p137_p10) target bundleno = 207 (0xcf), region = 28  ;;  %s444_s15 = sshll.u32 (!%p137_p10), %s159_s8, 6 }
  0x10   : > { %s736_s16 = scalar_lea.vmem (!%p137_p10), [#allocation2], %s444_s15  ;;  %s499_s18 = sshll.u32 (!%p137_p10), %s634_s12, 6 }
  0x11   : > { %s357_s25 = sshll.u32 (!%p137_p10), %s736_s16, 4  ;;  %s584_s3 = scalar_lea.hbm (!%p137_p10), %s787_s2, 128  ;;  %s358_s25 = int_to_ptr.vmem [resolvable:$true] %s357_s25 }
  0x14   : > { %s164_s23 = scalar_select %p163_p11, %s634_s12, 1  ;;  %vm245_vm0 = vcmask 1041408   ;;  %v491_v19 = vld [vmem:[%s786_s1] sm:$0xff]  ;;  %v493_v20 = vld [vmem:[%s786_s1 + $0x10] sm:$0xff]  ;;  %vm232_vm1 = vcmask 293888   ;;  %v492_v21 = vld [vmem:[%s786_s1 + $0x8] sm:$0xff] }
  0x15   : > { %v494_v22 = vld [vmem:[%s786_s1 + $0x18] sm:$0xff]  ;;  %s343_s12 = scalar_lea.sflag [#allocation3], %s159_s8 }
  0x16   : > { %s506_s24 = smul.u32 40, %s164_s23 }
  0x18   : > { %s170_s27 = scalar_lea.vmem %s785_s0, %s506_s24  ;;  %s356_s24 = scalar_lea.hbm %s787_s2, %s499_s18 }
  0x19   : > { %v186_v0 = vld [vmem:[%s170_s27 + $0x20] sm:$0x33]  ;;  %v472_v5 = vld [vmem:[%s170_s27 + $0x10] sm:$0xf]  ;;  %v498_v6 = vld [vmem:[%s170_s27 + $0x14] sm:$0xf0] }
  0x1a   : > { %v220_v1 = vunpack.c.l.b16 %v186_v0  ;;  %v221_v2 = vunpack.c.h.b16 %v186_v0  ;;  %v497_v7 = vld [vmem:[%s170_s27 + $0x14] sm:$0xf]  ;;  %v474_v8 = vld [vmem:[%s170_s27 + $0x18] sm:$0xf0]  ;;  %v473_v11 = vor.u32 %v498_v6, %v472_v5  ;;  %v464_v13 = vld [vmem:[%s170_s27] sm:$0xf] }
  0x1b   : > { %v477_v12 = vor.u32 %v497_v7, %v474_v8  ;;  %v496_v14 = vld [vmem:[%s170_s27 + $0x4] sm:$0xf0]  ;;  %v495_v15 = vld [vmem:[%s170_s27 + $0x4] sm:$0xf]  ;;  %v466_v16 = vld [vmem:[%s170_s27 + $0x8] sm:$0xf0] }
  0x1c   : > { %v226_v3 = vpack.c.b16 %v220_v1, %v220_v1  ;;  %v227_v4 = vpack.c.b16 %v221_v2, %v221_v2  ;;  %v465_v17 = vor.u32 %v496_v14, %v464_v13  ;;  %v469_v18 = vor.u32 %v495_v15, %v466_v16  ;;  %s359_s26 = sshll.u32 %s356_s24, 4  ;;  %s360_s26 = int_to_ptr.hbm [resolvable:$true] %s359_s26 }
  0x1d   : > { %s578_s27 = sshra.s32 %s360_s26, 4  ;;  %s579_s27 = int_to_ptr.hbm [resolvable:$true] %s578_s27 }
  0x1e   : > { %v247_v9 = vsel %vm245_vm0, %v226_v3, 0  ;;  %v250_v10 = vsel %vm245_vm0, %v227_v4, 0  ;;  %s580_s28 = scalar_lea.hbm %s579_s27, 64  ;;  %p585_p1 = scmp.lt.s32.totalorder %s579_s27, %s787_s2 }
  0x1f   : > { %257 = vmatpush.bf16.msra.mxu0 %v247_v9  ;;  %500 = vmatpush.bf16.msra.mxu2 %v247_v9  ;;  %p581_p12 = scmp.ne.s32.totalorder %s579_s27, %s580_s28  ;;  %p586_p2 = scmp.lt.s32.totalorder %s584_s3, %s580_s28 }
  0x20   : > { %286 = vmatpush.bf16.msra.mxu1 %v250_v10  ;;  %503 = vmatpush.bf16.msra.mxu3 %v250_v10 }
  0x21   : > { %p582_p13 = pnand %p581_p12, %p701_p4  ;;  %p587_p3 = por %p586_p2, %p585_p1 }
  0x23   : > { %258 = vmatpush.bf16.msra.mxu0 %v473_v11  ;;  %501 = vmatpush.bf16.msra.mxu2 %v473_v11  ;;  %p583_p0 = pneg %p582_p13 }
  0x24   : > { %287 = vmatpush.bf16.msra.mxu1 %v477_v12  ;;  %504 = vmatpush.bf16.msra.mxu3 %v477_v12 }
  0x25   : > { %p588_p5 = pnand %p587_p3, %p583_p0 }
  0x27   : > { %259 = vmatpush.bf16.msra.mxu0 %v465_v17  ;;  %502 = vmatpush.bf16.msra.mxu2 %v465_v17 }
  0x28   : > { %288 = vmatpush.bf16.msra.mxu1 %v469_v18  ;;  %505 = vmatpush.bf16.msra.mxu3 %v469_v18 }
  0x2a   : > { %478 = vmatmul.msk.bf16.vlgmr.msra.gmra.mxu0 %vm232_vm1, %v491_v19  ;;  %480 = vmatmul.msk.bf16.vlgmr.msra.gmra.mxu2 %vm232_vm1, %v493_v20 }
  0x2b   : > { %482 = vmatmul.msk.bf16.vlgmr.msra.gmra.mxu1 %vm232_vm1, %v491_v19  ;;  %484 = vmatmul.msk.bf16.vlgmr.msra.gmra.mxu3 %vm232_vm1, %v493_v20 }
  0x3a   : > { %479 = vmatmul.msk.bf16.gmra.mxu0 %vm232_vm1, %v492_v21  ;;  %481 = vmatmul.msk.bf16.gmra.mxu2 %vm232_vm1, %v494_v22 }
  0x3b   : > { %483 = vmatmul.msk.bf16.gmra.mxu1 %vm232_vm1, %v492_v21  ;;  %485 = vmatmul.msk.bf16.gmra.mxu3 %vm232_vm1, %v494_v22 }
  0xa7   : > { %v261_v23 = vpop.f32.mrf.mxu0 }
  0xa8   : > { %v310_v24 = vmax.f32 %v261_v23, 0.0  ;;  %v290_v25 = vpop.f32.mrf.mxu1 }
  0xa9   : > { %v311_v26 = vmax.f32 %v290_v25, 0.0 }
  0xab   : > { %v326_v27 = vpack.c.bf16 %v311_v26, %v310_v24 }
  0xad   : > { %334 = vst [vmem:[%s736_s16] sm:$0xff] %v326_v27  ;;  %v271_v28 = vpop.f32.mrf.mxu2 }
  0xae   : > { %v318_v29 = vmax.f32 %v271_v28, 0.0  ;;  %v300_v30 = vpop.f32.mrf.mxu3 }
  0xaf   : > { %v319_v31 = vmax.f32 %v300_v30, 0.0  ;;  %v263_v32 = vpop.f32.mrf.mxu0 }
  0xb0   : > { %v312_v33 = vmax.f32 %v263_v32, 0.0  ;;  %v292_v34 = vpop.f32.mrf.mxu1 }
  0xb1   : > { %v330_v35 = vpack.c.bf16 %v319_v31, %v318_v29  ;;  %v313_v36 = vmax.f32 %v292_v34, 0.0 }
  0xb3   : > { %338 = vst [vmem:[%s736_s16 + $0x20] sm:$0xff] %v330_v35  ;;  %v327_v37 = vpack.c.bf16 %v313_v36, %v312_v33 }
  0xb5   : > { %335 = vst [vmem:[%s736_s16 + $0x8] sm:$0xff] %v327_v37  ;;  %v273_v38 = vpop.f32.mrf.mxu2 }
  0xb6   : > { %v320_v39 = vmax.f32 %v273_v38, 0.0  ;;  %v302_v40 = vpop.f32.mrf.mxu3 }
  0xb7   : > { %v321_v41 = vmax.f32 %v302_v40, 0.0  ;;  %v266_v42 = vpop.f32.mrf.mxu0 }
  0xb8   : > { %v314_v43 = vmax.f32 %v266_v42, 0.0  ;;  %v295_v44 = vpop.f32.mrf.mxu1 }
  0xb9   : > { %v331_v45 = vpack.c.bf16 %v321_v41, %v320_v39  ;;  %v315_v46 = vmax.f32 %v295_v44, 0.0 }
  0xbb   : > { %339 = vst [vmem:[%s736_s16 + $0x28] sm:$0xff] %v331_v45  ;;  %v328_v47 = vpack.c.bf16 %v315_v46, %v314_v43 }
  0xbd   : > { %336 = vst [vmem:[%s736_s16 + $0x10] sm:$0xff] %v328_v47  ;;  %v276_v48 = vpop.f32.mrf.mxu2 }
  0xbe   : > { %v322_v49 = vmax.f32 %v276_v48, 0.0  ;;  %v305_v50 = vpop.f32.mrf.mxu3 }
  0xbf   : > { %v323_v51 = vmax.f32 %v305_v50, 0.0  ;;  %v268_v52 = vpop.f32.mrf.mxu0 }
  0xc0   : > { %v316_v53 = vmax.f32 %v268_v52, 0.0  ;;  %v297_v54 = vpop.f32.mrf.mxu1 }
  0xc1   : > { %v332_v55 = vpack.c.bf16 %v323_v51, %v322_v49  ;;  %v317_v56 = vmax.f32 %v297_v54, 0.0 }
  0xc3   : > { %340 = vst [vmem:[%s736_s16 + $0x30] sm:$0xff] %v332_v55  ;;  %v329_v57 = vpack.c.bf16 %v317_v56, %v316_v53 }
  0xc5   : > { %337 = vst [vmem:[%s736_s16 + $0x18] sm:$0xff] %v329_v57  ;;  %v278_v58 = vpop.f32.mrf.mxu2 }
  0xc6   : > { %v324_v59 = vmax.f32 %v278_v58, 0.0  ;;  %v307_v60 = vpop.f32.mrf.mxu3 }
  0xc7   : > { %v325_v61 = vmax.f32 %v307_v60, 0.0 }
  0xc9   : > { %v333_v62 = vpack.c.bf16 %v325_v61, %v324_v59 }
  0xcb   : > { %341 = vst [vmem:[%s736_s16 + $0x38] sm:$0xff] %v333_v62 }
  0xcc   : > { %591 = shalt.err (!%p588_p5)
}
  0xcd   : > { %s644_s6 = smov 128   ;;  %s645_s7 = smov 8  }
  0xce   : > { %507 = dma.vmem_to_hbm [thread:$0]  (%p701_p4), %s358_s25, 1024, %s360_s26, %s343_s12, %s644_s6, %s644_s6, %s645_s7  }
  0xcf PF: > { %p513_p6 = scmp.ge.s32.totalorder %s642_s14, 2  ;;  %s374_s8 = sand.u32 1, %s622_s9  }
  0xd0   : > { %s375_s15 = scalar_lea.sflag [#allocation3], %s374_s8 }
  0xd1   : > { %p510_p7 = pnand %p513_p6, %p708_p8 }
  0xd3   : > { %p511_p9 = pneg %p510_p7 }
  0xd5   : > { %617 = dma.done.wait (%p511_p9), %s375_s15, 1024  }
  0xd6   : > { %619 = vsyncadd (%p511_p9), %s375_s15, 4294966272  ;;  %s15_s14 = sadd.s32 1, %s642_s14   ;;  %s790_s9 = smov %s626_s10 }
  0xd7   : > { %p12_p10 = scmp.ge.s32.totalorder %s15_s14, 4   ;;  %s791_s10 = smov %s630_s11 }
  0xd8   : > { %s792_s11 = smov %s714_s22  ;;  %s793_s12 = smov %s638_s13 }
  0xd9   : > { %s794_s13 = smov %s796_s17  ;;  %14 = sbr.rel (!%p12_p10) target bundleno = 4 (0x4), region = 63 }
  0xde   :  { %381 = vsyncpa [#allocation3], 1 }
  0xdf   :  { %383 = vsyncpa [#allocation3 + $0x1], 1 }

</bundles_post_ra>
